<compile_context>
chip_gen: v6e
topology: v6e:2x2x1
jax: 0.10.0
libtpu: 0.0.40
codegen_flags: <defaults>
</compile_context>

<pallas_src>
from functools import partial

import jax
import jax.numpy as jnp
from jax.experimental import pallas as pl

# Static indices taken from the module definition.
X_PUT_ROW_A = 10                  # x[10] = y[0]
# x[2] = y[1] and x[1] = 45.0 are adjacent rows -> coalesced into one store.
X_SET_VAL = 45.0
# accumulate w[k] into z[i,j,:] for (i,j) in ((1,3),(0,2),(0,1)); all pairs
# distinct, so independent static row adds are equivalent to accumulate=True.
# After flattening z's leading dims with stride nc: (0,1)->1, (0,2)->2 (always,
# for any nc>=3) and (1,3)->nc+3.


def _index_put_kernel(z_row_w0, x_ref, y_ref, z_ref, w_ref, xo_ref, zo_ref):
    d = xo_ref.shape[-1]

    # ---------------- x path: bulk copy, then static row patches ----------------
    xo_ref[...] = x_ref[...]
    xo_ref[X_PUT_ROW_A:X_PUT_ROW_A + 1, :] = y_ref[0:1, :]
    # rows 1..2 coalesced into a single (2, D) store:
    #   row 1 -> 45.0 (final overwrite), row 2 -> y[1]
    xo_ref[1:3, :] = jnp.concatenate(
        [jnp.full((1, d), X_SET_VAL, xo_ref.dtype), y_ref[1:2, :]], axis=0)
    # x[tensor([], dtype=int64)] = 233.0  -> empty index set, provable no-op

    # ------------- z path (flattened rows): bulk copy, then row adds -------------
    zo_ref[...] = z_ref[...]
    # flat rows 1,2 (orig (0,1),(0,2)) coalesced into one (2, D) add:
    #   row 1 += w[2], row 2 += w[1]
    zo_ref[1:3, :] = z_ref[1:3, :] + jnp.concatenate(
        [w_ref[2:3, :], w_ref[1:2, :]], axis=0)
    # flat row nc+3 (orig (1,3)) += w[0]
    zo_ref[z_row_w0:z_row_w0 + 1, :] = (
        z_ref[z_row_w0:z_row_w0 + 1, :] + w_ref[0:1, :])


def _index_put_pallas(x, y, z_flat, w, z_row_w0):
    itemsize = jnp.dtype(x.dtype).itemsize
    bytes_accessed = int(
        (2 * x.size + y.size + 2 * z_flat.size + w.size) * itemsize)

    return pl.pallas_call(
        partial(_index_put_kernel, z_row_w0),
        out_shape=(
            jax.ShapeDtypeStruct(x.shape, x.dtype),
            jax.ShapeDtypeStruct(z_flat.shape, z_flat.dtype),
        ),
        in_specs=[
            pl.BlockSpec(x.shape, lambda: (0,) * x.ndim),
            pl.BlockSpec(y.shape, lambda: (0,) * y.ndim),
            pl.BlockSpec(z_flat.shape, lambda: (0, 0)),
            pl.BlockSpec(w.shape, lambda: (0,) * w.ndim),
        ],
        out_specs=(
            pl.BlockSpec(x.shape, lambda: (0,) * x.ndim),
            pl.BlockSpec(z_flat.shape, lambda: (0, 0)),
        ),
        # x -> first output, z -> second output ("clone + scatter" in place;
        # real in HBM because the caller donates x and z).
        input_output_aliases={0: 0, 2: 1},
        cost_estimate=pl.CostEstimate(
            flops=3 * x.shape[-1],          # three row adds
            transcendentals=0,
            bytes_accessed=bytes_accessed,
        ),
    )(x, y, z_flat, w)


@partial(jax.jit, donate_argnums=(0, 2))
def index_put_model(x, y, z, w):
    # Flatten z's leading (2, 4) dims so every row is a full (1, D) lane-dense
    # tile (middle dim 4 < 8 sublanes would otherwise be half-padded).
    nb, nc, d = z.shape
    z_flat = z.reshape(nb * nc, d)
    xo, zo_flat = _index_put_pallas(x, y, z_flat, w, z_row_w0=1 * nc + 3)
    return xo, zo_flat.reshape(nb, nc, d)


if __name__ == "__main__":
    key = jax.random.PRNGKey(0)
    kx, ky, kz, kw = jax.random.split(key, 4)

    D = 128  # lane-dense last dim (multiple of 128) -> unmasked vector stores
    # x needs >= 11 rows (index 10); z needs dim0 >= 2, dim1 >= 4.
    x = jax.random.normal(kx, (16, D), dtype=jnp.float32)
    y = jax.random.normal(ky, (2, D), dtype=jnp.float32)
    z = jax.random.normal(kz, (2, 4, D), dtype=jnp.float32)
    w = jax.random.normal(kw, (3, D), dtype=jnp.float32)

    # Pure-JAX reference (mirrors the PyTorch semantics). Computed and
    # materialized BEFORE the kernel call because x and z are donated.
    x_expect = x.at[jnp.array([10, 2])].set(y)
    x_expect = x_expect.at[1].set(45.0)
    # empty-index assignment of 233.0 is a no-op
    z_expect = z.at[jnp.array([1, 0, 0]), jnp.array([3, 2, 1])].add(w)
    x_expect, z_expect = jax.block_until_ready((x_expect, z_expect))

    xo, zo = jax.block_until_ready(index_put_model(x, y, z, w))

    assert jnp.allclose(xo, x_expect, atol=1e-6), "x output mismatch"
    assert jnp.allclose(zo, z_expect, atol=1e-6), "z output mismatch"
    print("KERNEL_OK")
</pallas_src>

<mosaic_0001>
module attributes {stable_mosaic.version = 11 : i64} {
  func.func @_index_put_kernel(%arg0: memref<16x128xf32, #tpu.memory_space<vmem>>, %arg1: memref<2x128xf32, #tpu.memory_space<vmem>>, %arg2: memref<8x128xf32, #tpu.memory_space<vmem>>, %arg3: memref<3x128xf32, #tpu.memory_space<vmem>>, %arg4: memref<16x128xf32, #tpu.memory_space<vmem>>, %arg5: memref<8x128xf32, #tpu.memory_space<vmem>>) attributes {dimension_semantics = [], scalar_prefetch = 0 : i64, scratch_operands = 0 : i64, tpu.core_type = #tpu.core_type<tc>} {
    %c0 = arith.constant 0 : index
    %c0_0 = arith.constant 0 : index
    %0 = vector.load %arg0[%c0, %c0_0] : memref<16x128xf32, #tpu.memory_space<vmem>>, vector<16x128xf32>
    %c0_1 = arith.constant 0 : index
    %c0_2 = arith.constant 0 : index
    %1 = vector.load %arg4[%c0_1, %c0_2] : memref<16x128xf32, #tpu.memory_space<vmem>>, vector<16x128xf32>
    tpu.vector_store %arg4[%c0_1, %c0_2], %0 {strides = array<i32>} : memref<16x128xf32, #tpu.memory_space<vmem>>, vector<16x128xf32>,
    %c0_3 = arith.constant 0 : index
    %c0_4 = arith.constant 0 : index
    %2 = vector.load %arg1[%c0_3, %c0_4] : memref<2x128xf32, #tpu.memory_space<vmem>>, vector<1x128xf32>
    %c10 = arith.constant 10 : index
    %c0_5 = arith.constant 0 : index
    %3 = vector.load %arg4[%c10, %c0_5] : memref<16x128xf32, #tpu.memory_space<vmem>>, vector<1x128xf32>
    tpu.vector_store %arg4[%c10, %c0_5], %2 {strides = array<i32>} : memref<16x128xf32, #tpu.memory_space<vmem>>, vector<1x128xf32>,
    %cst = arith.constant 4.500000e+01 : f32
    %4 = vector.broadcast %cst : f32 to vector<1x128xf32>
    %c1 = arith.constant 1 : index
    %c0_6 = arith.constant 0 : index
    %5 = vector.load %arg1[%c1, %c0_6] : memref<2x128xf32, #tpu.memory_space<vmem>>, vector<1x128xf32>
    %6 = tpu.concatenate %4, %5 in 0 : vector<1x128xf32>, vector<1x128xf32> -> vector<2x128xf32>
    %c1_7 = arith.constant 1 : index
    %c0_8 = arith.constant 0 : index
    %7 = vector.load %arg4[%c1_7, %c0_8] : memref<16x128xf32, #tpu.memory_space<vmem>>, vector<2x128xf32>
    tpu.vector_store %arg4[%c1_7, %c0_8], %6 {strides = array<i32>} : memref<16x128xf32, #tpu.memory_space<vmem>>, vector<2x128xf32>,
    %c0_9 = arith.constant 0 : index
    %c0_10 = arith.constant 0 : index
    %8 = vector.load %arg2[%c0_9, %c0_10] : memref<8x128xf32, #tpu.memory_space<vmem>>, vector<8x128xf32>
    %c0_11 = arith.constant 0 : index
    %c0_12 = arith.constant 0 : index
    %9 = vector.load %arg5[%c0_11, %c0_12] : memref<8x128xf32, #tpu.memory_space<vmem>>, vector<8x128xf32>
    tpu.vector_store %arg5[%c0_11, %c0_12], %8 {strides = array<i32>} : memref<8x128xf32, #tpu.memory_space<vmem>>, vector<8x128xf32>,
    %c1_13 = arith.constant 1 : index
    %c0_14 = arith.constant 0 : index
    %10 = vector.load %arg2[%c1_13, %c0_14] : memref<8x128xf32, #tpu.memory_space<vmem>>, vector<2x128xf32>
    %c2 = arith.constant 2 : index
    %c0_15 = arith.constant 0 : index
    %11 = vector.load %arg3[%c2, %c0_15] : memref<3x128xf32, #tpu.memory_space<vmem>>, vector<1x128xf32>
    %c1_16 = arith.constant 1 : index
    %c0_17 = arith.constant 0 : index
    %12 = vector.load %arg3[%c1_16, %c0_17] : memref<3x128xf32, #tpu.memory_space<vmem>>, vector<1x128xf32>
    %13 = tpu.concatenate %11, %12 in 0 : vector<1x128xf32>, vector<1x128xf32> -> vector<2x128xf32>
    %14 = arith.addf %10, %13 : vector<2x128xf32>
    %c1_18 = arith.constant 1 : index
    %c0_19 = arith.constant 0 : index
    %15 = vector.load %arg5[%c1_18, %c0_19] : memref<8x128xf32, #tpu.memory_space<vmem>>, vector<2x128xf32>
    tpu.vector_store %arg5[%c1_18, %c0_19], %14 {strides = array<i32>} : memref<8x128xf32, #tpu.memory_space<vmem>>, vector<2x128xf32>,
    %c7 = arith.constant 7 : index
    %c0_20 = arith.constant 0 : index
    %16 = vector.load %arg2[%c7, %c0_20] : memref<8x128xf32, #tpu.memory_space<vmem>>, vector<1x128xf32>
    %c0_21 = arith.constant 0 : index
    %c0_22 = arith.constant 0 : index
    %17 = vector.load %arg3[%c0_21, %c0_22] : memref<3x128xf32, #tpu.memory_space<vmem>>, vector<1x128xf32>
    %18 = arith.addf %16, %17 : vector<1x128xf32>
    %c7_23 = arith.constant 7 : index
    %c0_24 = arith.constant 0 : index
    %19 = vector.load %arg5[%c7_23, %c0_24] : memref<8x128xf32, #tpu.memory_space<vmem>>, vector<1x128xf32>
    tpu.vector_store %arg5[%c7_23, %c0_24], %18 {strides = array<i32>} : memref<8x128xf32, #tpu.memory_space<vmem>>, vector<1x128xf32>,
    return
  }
}

</mosaic_0001>

<bundles_post_ra>
// kernel: index_put_model.1
= control target key start
LH: loop header
LB: loop body
LE: loop exit
PB: predicated region body
PF: predicated region fallthrough
CT: control target
= control target key end

     0   :  { %11 = vsyncpa [#allocation3], 0  ;;  %s272_s0 = inlined_call_operand.hbm [shape: f32[16,128], index: 0, kind: input, shape index: {}, may-alias: {0,4}]   ;;  %s273_s1 = inlined_call_operand.vmem [shape: f32[2,128], index: 1, kind: input, shape index: {}]   ;;  %s274_s2 = inlined_call_operand.hbm [shape: f32[8,128], index: 2, kind: input, shape index: {}, may-alias: {2,5}]   ;;  %s275_s3 = inlined_call_operand.vmem [shape: f32[3,128], index: 3, kind: input, shape index: {}]   ;;  %s276_s4 = inlined_call_operand.hbm [shape: f32[16,128], index: 4, kind: output, shape index: {0}, may-alias: {0,4}]   ;;  %s277_s5 = inlined_call_operand.hbm [shape: f32[8,128], index: 5, kind: output, shape index: {1}, may-alias: {2,5}]  }
   0x1   :  { %12 = vsyncpa [#allocation6], 0 }
   0x2   :  { %13 = vsyncpa [#allocation4], 0 }
   0x3   :  { %14 = vsyncpa [#allocation9], 0  ;;  %s201_s18 = smov [#allocation2]  }
   0x4   :  { %s20_s19 = sshll.u32 %s201_s18, 4  ;;  %s21_s19 = int_to_ptr.vmem [resolvable:$true] %s20_s19 }
   0x5   :  { %s121_s20 = scalar_lea.vmem %s21_s19, 256  ;;  %p126_p1 = scmp.lt.s32.totalorder %s21_s19, %s21_s19 }
   0x6   :  { %p122_p0 = scmp.ne.s32.totalorder %s21_s19, %s121_s20  ;;  %p127_p2 = scmp.lt.s32.totalorder %s121_s20, %s121_s20 }
   0x8   :  { %p128_p3 = por %p127_p2, %p126_p1 }
   0xa   :  { %p129_p4 = pnand %p128_p3, %p122_p0 }
   0xc   :  { %132 = shalt.err (!%p129_p4)
}
   0xd   :  { %s202_s21 = smov 128   ;;  %s203_s22 = smov 8  }
   0xe   :  { %26 = dma.hbm_to_vmem [thread:$0]  %s272_s0, 256, %s21_s19, [#allocation3], %s202_s21, %s202_s21, %s203_s22  }
   0xf   :  { %s204_s25 = smov [#allocation5]  }
  0x10   :  { %s35_s26 = sshll.u32 %s204_s25, 4  ;;  %s36_s26 = int_to_ptr.vmem [resolvable:$true] %s35_s26 }
  0x11   :  { %s141_s27 = scalar_lea.vmem %s36_s26, 128  ;;  %p146_p6 = scmp.lt.s32.totalorder %s36_s26, %s36_s26 }
  0x12   :  { %p142_p5 = scmp.ne.s32.totalorder %s36_s26, %s141_s27  ;;  %p147_p7 = scmp.lt.s32.totalorder %s141_s27, %s141_s27 }
  0x14   :  { %p148_p8 = por %p147_p7, %p146_p6 }
  0x16   :  { %p149_p9 = pnand %p148_p8, %p142_p5 }
  0x18   :  { %152 = shalt.err (!%p149_p9)
}
  0x19   :  { %38 = dma.hbm_to_vmem [thread:$0]  %s274_s2, 128, %s36_s26, [#allocation6]  }
  0x1a   :  { %193 = dma.done.wait [#allocation3], 256  }
  0x1b   :  { %194 = vsyncadd [#allocation3], 4294967040 }
  0x1c   :  { %195 = dma.done.wait [#allocation6], 128  }
  0x1d   :  { %196 = vsyncadd [#allocation6], 4294967168  ;;  %v47_v0 = vld [vmem:[#allocation2] sm:$0xff]  ;;  %v48_v1 = vld [vmem:[#allocation2 + $0x8] sm:$0xff]  ;;  %vm57_vm0 = vcmask 1040384   ;;  %s205_s0 = smov [#allocation7]  }
  0x1e   :  { %v60_v2 = vld [vmem:[#allocation5] sm:$0xff]  ;;  %s80_s30 = sshll.u32 %s205_s0, 4  ;;  %49 = vst [vmem:[#allocation7] sm:$0xff] %v47_v0  ;;  %50 = vst [vmem:[#allocation7 + $0x8] sm:$0xff] %v48_v1  ;;  %v51_v3 = vld [vmem:[%s273_s1] sm:$0x1]  ;;  %s81_s30 = int_to_ptr.vmem [resolvable:$true] %s80_s30 }
  0x1f   :  { %61 = vst [vmem:[#allocation8] sm:$0xff] %v60_v2  ;;  %v53_v4 = vld [vmem:[%s273_s1 + $0x1] sm:$0x1]  ;;  %v62_v5 = vld [vmem:[#allocation5 + $0x1] sm:$0x3]  ;;  %s206_s13 = smov [#allocation8]   ;;  %p158_p11 = scmp.lt.s32.totalorder %s81_s30, %s81_s30 }
  0x20   :  { %52 = vst [vmem:[#allocation7 + $0xa] sm:$0x1] %v51_v3  ;;  %v55_v6 = vrot.slane %v53_v4, 7  ;;  %v63_v7 = vld [vmem:[%s275_s3 + $0x2] sm:$0x1]  ;;  %s93_s14 = sshll.u32 %s206_s13, 4  ;;  %s94_s14 = int_to_ptr.vmem [resolvable:$true] %s93_s14 }
  0x21   :  { %v64_v8 = vld [vmem:[%s275_s3 + $0x1] sm:$0x1]  ;;  %v71_v10 = vld [vmem:[#allocation5 + $0x7] sm:$0x1]  ;;  %v72_v11 = vld [vmem:[%s275_s3] sm:$0x1] }
  0x22   :  { %v66_v9 = vrot.slane %v64_v8, 7  ;;  %v58_v12 = vsel %vm57_vm0, 45.0, %v55_v6  ;;  %v73_v13 = vadd.f32 %v72_v11, %v71_v10  ;;  %s153_s1 = scalar_lea.vmem %s81_s30, 256 }
  0x23   :  { %59 = vst [vmem:[#allocation7 + $0x1] sm:$0x3] %v58_v12  ;;  %p154_p10 = scmp.ne.s32.totalorder %s81_s30, %s153_s1  ;;  %p159_p12 = scmp.lt.s32.totalorder %s153_s1, %s153_s1 }
  0x24   :  { %v68_v14 = vsel %vm57_vm0, %v63_v7, %v66_v9  ;;  %74 = vst [vmem:[#allocation8 + $0x7] sm:$0x1] %v73_v13 }
  0x25   :  { %v69_v15 = vadd.f32 %v68_v14, %v62_v5  ;;  %p160_p13 = por %p159_p12, %p158_p11 }
  0x27   :  { %p161_p0 = pnand %p160_p13, %p154_p10 }
  0x29   :  { %164 = shalt.err (!%p161_p0)
}
  0x2a   :  { %86 = dma.vmem_to_hbm [thread:$0]  %s81_s30, 256, %s276_s4, [#allocation4], %s202_s21, %s202_s21, %s203_s22   ;;  %70 = vst [vmem:[#allocation8 + $0x1] sm:$0x3] %v69_v15 }
  0x2b   :  { %s173_s18 = scalar_lea.vmem %s94_s14, 128  ;;  %p178_p2 = scmp.lt.s32.totalorder %s94_s14, %s94_s14 }
  0x2c   :  { %p174_p1 = scmp.ne.s32.totalorder %s94_s14, %s173_s18  ;;  %p179_p3 = scmp.lt.s32.totalorder %s173_s18, %s173_s18 }
  0x2e   :  { %p180_p4 = por %p179_p3, %p178_p2 }
  0x30   :  { %p181_p5 = pnand %p180_p4, %p174_p1 }
  0x32   :  { %184 = shalt.err (!%p181_p5)
}
  0x33   :  { %96 = dma.vmem_to_hbm [thread:$0]  %s94_s14, 128, %s277_s5, [#allocation9]  }
  0x34   :  { %197 = dma.done.wait [#allocation4], 256  }
  0x35   :  { %198 = vsyncadd [#allocation4], 4294967040 }
  0x36   :  { %199 = dma.done.wait [#allocation9], 128  }
  0x37   :  { %200 = vsyncadd [#allocation9], 4294967168 }
  0x38   :  { %103 = vsyncpa [#allocation3], 1 }
  0x39   :  { %104 = vsyncpa [#allocation6], 1 }
  0x3a   :  { %105 = vsyncpa [#allocation4], 1 }
  0x3b   :  { %106 = vsyncpa [#allocation9], 1 }

</bundles_post_ra>
